<compile_context>
chip_gen: v5e
topology: v5e:2x2
jax: 0.10.0
libtpu: 0.0.40
codegen_flags: <defaults>
</compile_context>

<pallas_src>
import math

import jax
import jax.numpy as jnp
from jax import lax
from jax.experimental import pallas as pl
from jax.experimental.pallas import tpu as pltpu

_NEG_BIG = -1e30  # finite stand-in for -inf (avoids NaN on fully-masked rows)


# ----------------------------------------------------------------------------
# Generation-aware VMEM budgeting.
# ----------------------------------------------------------------------------
def _vmem_capacity_bytes():
    try:
        return int(pltpu.get_tpu_info().vmem_capacity_bytes)
    except Exception:
        return 64 * 1024 * 1024  # conservative fallback: v7x per-TensorCore VMEM


def _vmem_budgets():
    cap = _vmem_capacity_bytes()
    vmem_limit = min((cap * 3) // 4, 100 * 1024 * 1024)  # explicit scoped limit
    tile_budget = (vmem_limit * 4) // 5                  # headroom for pipeline state
    return vmem_limit, tile_budget


def _pick_block_q(B, Lq, Lk, D, Dv, itemsize, attn_itemsize, budget, has_mask,
                  return_attn):
    """Largest q-tile (multiple of 8, up to 512) that fits the VMEM budget."""
    candidates = [512, 256, 128, 64, 32, 16, 8]
    if has_mask:
        # int8 mask native tile is (32, 128); smaller sublane blocks force relayout.
        candidates = [c for c in candidates if c >= 32]
    if B == 1 and Lq >= 16:
        # v7x megacore: keep >= 2 parallel grid steps when batch is 1.
        cap = max(8, Lq // 2)
        candidates = [c for c in candidates if c <= cap] or [8]
    candidates = [c for c in candidates if c <= Lq]
    divisors = [c for c in candidates if Lq % c == 0]
    options = divisors if divisors else candidates  # Pallas pads the last q-tile
    if not options:
        return Lq  # full dim is always a legal block
    fixed = 2 * Lk * (D + Dv) * itemsize             # K + V, double-buffered
    for tq in options:
        per_tile = (2 * tq * (D + Dv) * itemsize     # q in + out, double-buffered
                    + tq * Lk * 4                    # f32 score tile
                    + (2 * tq * Lk * attn_itemsize if return_attn else 0)
                    + (2 * tq * Lk if has_mask else 0))
        if fixed + per_tile <= budget:
            return tq
    return options[-1]


def _pick_block_k(Lk):
    for c in (512, 256, 128):
        if c < Lk and Lk % c == 0:
            return c
    return Lk


# ----------------------------------------------------------------------------
# Kernels.
# ----------------------------------------------------------------------------
def _make_qk(d_model, compute_dtype):
    inv_temper = 1.0 / math.sqrt(float(d_model))

    def qk(q, k):
        qs = (q * inv_temper).astype(compute_dtype)   # fold scale into the small side
        return lax.dot_general(qs, k.astype(compute_dtype),
                               dimension_numbers=(((1,), (1,)), ((), ())),
                               preferred_element_type=jnp.float32)
    return qk


def _make_single_pass_kernels(d_model, compute_dtype):
    qk = _make_qk(d_model, compute_dtype)

    def _softmax_stats(s):
        s_max = jnp.max(s, axis=-1, keepdims=True)
        e = jnp.exp(s - s_max)
        denom = jnp.sum(e, axis=-1, keepdims=True)
        return e, denom

    def _pv(p, v):
        return jnp.dot(p.astype(compute_dtype), v.astype(compute_dtype),
                       preferred_element_type=jnp.float32)

    # --- variants that also return the attention weights (module semantics) ---
    def kernel_attn_nomask(q_ref, k_ref, v_ref, out_ref, attn_ref):
        s = qk(q_ref[0], k_ref[0])
        e, denom = _softmax_stats(s)
        p = e * pl.reciprocal(denom, approx=True)     # EUP reciprocal + VPU mul
        attn_ref[0] = p.astype(attn_ref.dtype)
        out_ref[0] = _pv(p, v_ref[0]).astype(out_ref.dtype)

    def kernel_attn_mask(q_ref, k_ref, v_ref, mask_ref, out_ref, attn_ref):
        s = qk(q_ref[0], k_ref[0])
        s = jnp.where(mask_ref[0] != 0, jnp.float32(_NEG_BIG), s)
        e, denom = _softmax_stats(s)
        p = e * pl.reciprocal(denom, approx=True)
        attn_ref[0] = p.astype(attn_ref.dtype)
        out_ref[0] = _pv(p, v_ref[0]).astype(out_ref.dtype)

    # --- output-only variants: normalize AFTER the PV matmul ((TQ,Dv) mul) ---
    def kernel_out_nomask(q_ref, k_ref, v_ref, out_ref):
        s = qk(q_ref[0], k_ref[0])
        e, denom = _softmax_stats(s)
        ev = _pv(e, v_ref[0])
        out_ref[0] = (ev * pl.reciprocal(denom, approx=True)).astype(out_ref.dtype)

    def kernel_out_mask(q_ref, k_ref, v_ref, mask_ref, out_ref):
        s = qk(q_ref[0], k_ref[0])
        s = jnp.where(mask_ref[0] != 0, jnp.float32(_NEG_BIG), s)
        e, denom = _softmax_stats(s)
        ev = _pv(e, v_ref[0])
        out_ref[0] = (ev * pl.reciprocal(denom, approx=True)).astype(out_ref.dtype)

    return kernel_attn_nomask, kernel_attn_mask, kernel_out_nomask, kernel_out_mask


def _make_flash_kernels(d_model, compute_dtype):
    """Lk-tiled online-softmax kernels (output only)."""
    qk = _make_qk(d_model, compute_dtype)

    def _accumulate(s, v, out_ref, m_sc, l_sc, acc_sc):
        ki = pl.program_id(2)

        @pl.when(ki == 0)
        def _():
            m_sc[...] = jnp.full_like(m_sc, -jnp.inf)
            l_sc[...] = jnp.zeros_like(l_sc)
            acc_sc[...] = jnp.zeros_like(acc_sc)

        m_new = jnp.maximum(m_sc[...], jnp.max(s, axis=-1, keepdims=True))
        alpha = jnp.exp(m_sc[...] - m_new)
        e = jnp.exp(s - m_new)
        l_sc[...] = alpha * l_sc[...] + jnp.sum(e, axis=-1, keepdims=True)
        acc_sc[...] = alpha * acc_sc[...] + jnp.dot(
            e.astype(compute_dtype), v.astype(compute_dtype),
            preferred_element_type=jnp.float32)
        m_sc[...] = m_new

        @pl.when(ki == pl.num_programs(2) - 1)
        def _():
            out_ref[0] = (acc_sc[...] * pl.reciprocal(l_sc[...], approx=True)
                          ).astype(out_ref.dtype)

    def kernel_nomask(q_ref, k_ref, v_ref, out_ref, m_sc, l_sc, acc_sc):
        s = qk(q_ref[0], k_ref[0])
        _accumulate(s, v_ref[0], out_ref, m_sc, l_sc, acc_sc)

    def kernel_mask(q_ref, k_ref, v_ref, mask_ref, out_ref, m_sc, l_sc, acc_sc):
        s = qk(q_ref[0], k_ref[0])
        s = jnp.where(mask_ref[0] != 0, jnp.float32(_NEG_BIG), s)
        _accumulate(s, v_ref[0], out_ref, m_sc, l_sc, acc_sc)

    return kernel_nomask, kernel_mask


# ----------------------------------------------------------------------------
# Wrapper.
# ----------------------------------------------------------------------------
def scaled_dot_product_attention(q, k, v, attn_mask=None, *, d_model=None,
                                 block_q=None, block_k=None,
                                 return_attn=True, attn_dtype=None,
                                 use_bf16_matmul=False):
    """Pallas implementation of ScaledDotProductAttention.forward (eval mode).

    q: (B, Lq, D), k: (B, Lk, D), v: (B, Lk, Dv)
    attn_mask: optional bool/int (B, Lq, Lk); nonzero/True entries are masked out.

    Returns (output, attn) like the PyTorch module when return_attn=True
    (the default); returns only `output` when return_attn=False (faster:
    skips the dominant (B, Lq, Lk) HBM writeback and can tile over Lk).
    """
    B, Lq, D = q.shape
    Bk, Lk, Dk = k.shape
    Bv, Lkv, Dv = v.shape
    assert Dk == D and Bk == B and Bv == B and Lkv == Lk
    if d_model is None:
        d_model = D
    if attn_dtype is None:
        attn_dtype = q.dtype
    attn_itemsize = jnp.dtype(attn_dtype).itemsize
    itemsize = q.dtype.itemsize
    compute_dtype = (jnp.bfloat16 if (use_bf16_matmul and q.dtype == jnp.float32)
                     else q.dtype)

    has_mask = attn_mask is not None
    if has_mask:
        assert attn_mask.shape == (B, Lq, Lk), (
            "Attention mask shape {} mismatch with Attention logit tensor "
            "shape {}.".format(attn_mask.shape, (B, Lq, Lk)))
        mask_i8 = attn_mask.astype(jnp.int8)   # 4x less HBM traffic than f32

    vmem_limit, tile_budget = _vmem_budgets()
    if block_q is None:
        block_q = _pick_block_q(B, Lq, Lk, D, Dv, itemsize, attn_itemsize,
                                tile_budget, has_mask, return_attn)
    num_q_tiles = pl.cdiv(Lq, block_q)

    # Advisory cost estimate for XLA's scheduler.
    flops = 2 * B * Lq * Lk * (D + Dv)
    transcendentals = B * Lq * Lk
    bytes_accessed = (q.size + k.size + v.size + B * Lq * Dv) * itemsize
    if has_mask:
        bytes_accessed += B * Lq * Lk
    if return_attn:
        bytes_accessed += B * Lq * Lk * attn_itemsize
    cost = pl.CostEstimate(flops=flops, transcendentals=transcendentals,
                           bytes_accessed=bytes_accessed)

    # Decide single-pass (full-row K/V) vs Lk-tiled online-softmax path.
    single_pass_bytes = (2 * Lk * (D + Dv) * itemsize
                         + 2 * block_q * (D + Dv) * itemsize
                         + block_q * Lk * 4
                         + (2 * block_q * Lk * attn_itemsize if return_attn else 0)
                         + (2 * block_q * Lk if has_mask else 0))
    use_flash = (not return_attn) and (block_k is not None
                                       or single_pass_bytes > tile_budget)

    (kernel_attn_nomask, kernel_attn_mask,
     kernel_out_nomask, kernel_out_mask) = _make_single_pass_kernels(
         d_model, compute_dtype)

    out_spec = pl.BlockSpec((1, block_q, Dv), lambda b, qi: (b, qi, 0))

    if not use_flash:
        q_spec = pl.BlockSpec((1, block_q, D), lambda b, qi: (b, qi, 0))
        k_spec = pl.BlockSpec((1, Lk, D), lambda b, qi: (b, 0, 0))
        v_spec = pl.BlockSpec((1, Lk, Dv), lambda b, qi: (b, 0, 0))
        mask_spec = pl.BlockSpec((1, block_q, Lk), lambda b, qi: (b, qi, 0))
        compiler_params = pltpu.CompilerParams(
            dimension_semantics=("parallel", "parallel"),
            vmem_limit_bytes=vmem_limit)

        if return_attn:
            out_shape = (jax.ShapeDtypeStruct((B, Lq, Dv), q.dtype),
                         jax.ShapeDtypeStruct((B, Lq, Lk), attn_dtype))
            out_specs = [out_spec,
                         pl.BlockSpec((1, block_q, Lk), lambda b, qi: (b, qi, 0))]
            kernel = kernel_attn_mask if has_mask else kernel_attn_nomask
        else:
            out_shape = jax.ShapeDtypeStruct((B, Lq, Dv), q.dtype)
            out_specs = out_spec
            kernel = kernel_out_mask if has_mask else kernel_out_nomask

        in_specs = [q_spec, k_spec, v_spec] + ([mask_spec] if has_mask else [])
        args = (q, k, v, mask_i8) if has_mask else (q, k, v)

        result = pl.pallas_call(
            kernel,
            out_shape=out_shape,
            grid_spec=pltpu.PrefetchScalarGridSpec(
                num_scalar_prefetch=0,
                grid=(B, num_q_tiles),
                in_specs=in_specs,
                out_specs=out_specs),
            compiler_params=compiler_params,
            cost_estimate=cost,
        )(*args)
        if return_attn:
            out, attn = result
            return out, attn
        return result

    # ---------------- Lk-tiled online-softmax ("flash") path ----------------
    if block_k is None:
        block_k = _pick_block_k(Lk)
    assert Lk % block_k == 0, "block_k must divide Lk for the Lk-tiled path"
    num_k_tiles = Lk // block_k

    flash_nomask, flash_mask = _make_flash_kernels(d_model, compute_dtype)

    q_spec = pl.BlockSpec((1, block_q, D), lambda b, qi, ki: (b, qi, 0))
    k_spec = pl.BlockSpec((1, block_k, D), lambda b, qi, ki: (b, ki, 0))
    v_spec = pl.BlockSpec((1, block_k, Dv), lambda b, qi, ki: (b, ki, 0))
    mask_spec = pl.BlockSpec((1, block_q, block_k), lambda b, qi, ki: (b, qi, ki))
    out_specs = pl.BlockSpec((1, block_q, Dv), lambda b, qi, ki: (b, qi, 0))

    in_specs = [q_spec, k_spec, v_spec] + ([mask_spec] if has_mask else [])
    args = (q, k, v, mask_i8) if has_mask else (q, k, v)
    kernel = flash_mask if has_mask else flash_nomask

    out = pl.pallas_call(
        kernel,
        out_shape=jax.ShapeDtypeStruct((B, Lq, Dv), q.dtype),
        grid_spec=pltpu.PrefetchScalarGridSpec(
            num_scalar_prefetch=0,
            grid=(B, num_q_tiles, num_k_tiles),
            in_specs=in_specs,
            out_specs=out_specs,
            scratch_shapes=[pltpu.VMEM((block_q, 1), jnp.float32),
                            pltpu.VMEM((block_q, 1), jnp.float32),
                            pltpu.VMEM((block_q, Dv), jnp.float32)]),
        compiler_params=pltpu.CompilerParams(
            dimension_semantics=("parallel", "parallel", "arbitrary"),
            vmem_limit_bytes=vmem_limit),
        cost_estimate=cost,
    )(*args)
    return out


# ----------------------------------------------------------------------------
# Pure-JAX reference and tests.
# ----------------------------------------------------------------------------
def _reference(q, k, v, attn_mask=None):
    d_model = q.shape[-1]
    s = jnp.einsum("bqd,bkd->bqk", q, k) / jnp.sqrt(jnp.float32(d_model))
    if attn_mask is not None:
        s = jnp.where(attn_mask != 0, jnp.float32(_NEG_BIG), s)
    p = jax.nn.softmax(s, axis=-1)
    return jnp.einsum("bqk,bkd->bqd", p, v), p


if __name__ == "__main__":
    key = jax.random.PRNGKey(0)

    # Case 1: small shapes, no mask, (output, attn) return (module semantics).
    B, Lq, Lk, D, Dv = 2, 8, 8, 32, 32
    kq, kk, kv, km = jax.random.split(key, 4)
    q = jax.random.normal(kq, (B, Lq, D), dtype=jnp.float32)
    k = jax.random.normal(kk, (B, Lk, D), dtype=jnp.float32)
    v = jax.random.normal(kv, (B, Lk, Dv), dtype=jnp.float32)

    out, attn = scaled_dot_product_attention(q, k, v, attn_mask=None, d_model=D)
    jax.block_until_ready((out, attn))
    ref_out, ref_attn = _reference(q, k, v)
    assert jnp.allclose(out, ref_out, atol=2e-3, rtol=2e-3)
    assert jnp.allclose(attn, ref_attn, atol=2e-3, rtol=2e-3)

    # Case 2: masked attention with q-tiling, attention weights returned.
    B2, Lq2, Lk2, D2, Dv2 = 2, 256, 128, 64, 64
    kq2, kk2, kv2, km2 = jax.random.split(km, 4)
    q2 = jax.random.normal(kq2, (B2, Lq2, D2), dtype=jnp.float32)
    k2 = jax.random.normal(kk2, (B2, Lk2, D2), dtype=jnp.float32)
    v2 = jax.random.normal(kv2, (B2, Lk2, Dv2), dtype=jnp.float32)
    mask2 = jax.random.bernoulli(km2, 0.25, (B2, Lq2, Lk2))

    out2, attn2 = scaled_dot_product_attention(q2, k2, v2, attn_mask=mask2,
                                               d_model=D2, block_q=128)
    jax.block_until_ready((out2, attn2))
    ref_out2, ref_attn2 = _reference(q2, k2, v2, attn_mask=mask2)
    assert jnp.allclose(out2, ref_out2, atol=2e-3, rtol=2e-3)
    assert jnp.allclose(attn2, ref_attn2, atol=2e-3, rtol=2e-3)

    # Case 3: output-only fast path with Lk tiling (online softmax), masked.
    B3, Lq3, Lk3, D3, Dv3 = 2, 128, 256, 64, 64
    kq3, kk3, kv3, km3 = jax.random.split(km2, 4)
    q3 = jax.random.normal(kq3, (B3, Lq3, D3), dtype=jnp.float32)
    k3 = jax.random.normal(kk3, (B3, Lk3, D3), dtype=jnp.float32)
    v3 = jax.random.normal(kv3, (B3, Lk3, Dv3), dtype=jnp.float32)
    mask3 = jax.random.bernoulli(km3, 0.25, (B3, Lq3, Lk3))

    out3 = scaled_dot_product_attention(q3, k3, v3, attn_mask=mask3, d_model=D3,
                                        block_q=64, block_k=128,
                                        return_attn=False)
    jax.block_until_ready(out3)
    ref_out3, _ = _reference(q3, k3, v3, attn_mask=mask3)
    assert jnp.allclose(out3, ref_out3, atol=2e-3, rtol=2e-3)

    # Case 4: bf16-MXU precision flag, output-only single-pass variant.
    out4 = scaled_dot_product_attention(q, k, v, attn_mask=None, d_model=D,
                                        return_attn=False, use_bf16_matmul=True)
    jax.block_until_ready(out4)
    assert jnp.allclose(out4, ref_out, atol=3e-2, rtol=3e-2)

    print("KERNEL_OK")
</pallas_src>

<mosaic_0001>
module attributes {stable_mosaic.version = 11 : i64} {
  func.func @kernel_attn_nomask(%arg0: i32, %arg1: i32, %arg2: memref<1x8x32xf32, #tpu.memory_space<vmem>>, %arg3: memref<1x8x32xf32, #tpu.memory_space<vmem>>, %arg4: memref<1x8x32xf32, #tpu.memory_space<vmem>>, %arg5: memref<1x8x32xf32, #tpu.memory_space<vmem>>, %arg6: memref<1x8x8xf32, #tpu.memory_space<vmem>>) attributes {dimension_semantics = [#tpu.dimension_semantics<parallel>, #tpu.dimension_semantics<parallel>], iteration_bounds = array<i64: 2, 1>, scalar_prefetch = 0 : i64, scratch_operands = 0 : i64, tpu.core_type = #tpu.core_type<tc>, window_params = [{transform_indices = @transform_0, window_bounds = array<i64: 1, 8, 32>}, {transform_indices = @transform_1, window_bounds = array<i64: 1, 8, 32>}, {transform_indices = @transform_2, window_bounds = array<i64: 1, 8, 32>}, {transform_indices = @transform_3, window_bounds = array<i64: 1, 8, 32>}, {transform_indices = @transform_4, window_bounds = array<i64: 1, 8, 8>}]} {
    %c0 = arith.constant 0 : index
    %c0_0 = arith.constant 0 : index
    %c0_1 = arith.constant 0 : index
    %0 = vector.load %arg2[%c0, %c0_0, %c0_1] : memref<1x8x32xf32, #tpu.memory_space<vmem>>, vector<1x8x32xf32>
    %1 = vector.shape_cast %0 : vector<1x8x32xf32> to vector<8x32xf32>
    %c0_2 = arith.constant 0 : index
    %c0_3 = arith.constant 0 : index
    %c0_4 = arith.constant 0 : index
    %2 = vector.load %arg3[%c0_2, %c0_3, %c0_4] : memref<1x8x32xf32, #tpu.memory_space<vmem>>, vector<1x8x32xf32>
    %3 = vector.shape_cast %2 : vector<1x8x32xf32> to vector<8x32xf32>
    %cst = arith.constant 0.176776692 : f32
    %4 = vector.broadcast %cst : f32 to vector<8x32xf32>
    %5 = arith.mulf %1, %4 : vector<8x32xf32>
    %cst_5 = arith.constant dense<0.000000e+00> : vector<8x8xf32>
    %6 = tpu.matmul %5, %3, %cst_5 {dimension_numbers = #tpu.dot_dimension_numbers<[1], [1], [0], [0], [0, 0, 1, 0], [], []>} : vector<8x32xf32>, vector<8x32xf32>, vector<8x8xf32> -> vector<8x8xf32>
    %cst_6 = arith.constant dense<0xFF800000> : vector<8xf32>
    %7 = vector.multi_reduction <maximumf>, %6, %cst_6 [1] : vector<8x8xf32> to vector<8xf32>
    %8 = vector.shape_cast %7 : vector<8xf32> to vector<8x1xf32>
    %9 = vector.broadcast %8 : vector<8x1xf32> to vector<8x8xf32>
    %10 = arith.subf %6, %9 : vector<8x8xf32>
    %11 = math.exp %10 : vector<8x8xf32>
    %cst_7 = arith.constant dense<0.000000e+00> : vector<8xf32>
    %12 = vector.multi_reduction <add>, %11, %cst_7 [1] : vector<8x8xf32> to vector<8xf32>
    %13 = vector.shape_cast %12 : vector<8xf32> to vector<8x1xf32>
    %14 = tpu.reciprocal %13 {approx = true} : vector<8x1xf32> -> vector<8x1xf32>
    %15 = vector.broadcast %14 : vector<8x1xf32> to vector<8x8xf32>
    %16 = arith.mulf %11, %15 : vector<8x8xf32>
    %c0_8 = arith.constant 0 : index
    %c0_9 = arith.constant 0 : index
    %c0_10 = arith.constant 0 : index
    %17 = vector.load %arg6[%c0_8, %c0_9, %c0_10] : memref<1x8x8xf32, #tpu.memory_space<vmem>>, vector<1x8x8xf32>
    %18 = vector.shape_cast %17 : vector<1x8x8xf32> to vector<8x8xf32>
    %19 = vector.shape_cast %16 : vector<8x8xf32> to vector<1x8x8xf32>
    tpu.vector_store %arg6[%c0_8, %c0_9, %c0_10], %19 {strides = array<i32>} : memref<1x8x8xf32, #tpu.memory_space<vmem>>, vector<1x8x8xf32>,
    %c0_11 = arith.constant 0 : index
    %c0_12 = arith.constant 0 : index
    %c0_13 = arith.constant 0 : index
    %20 = vector.load %arg4[%c0_11, %c0_12, %c0_13] : memref<1x8x32xf32, #tpu.memory_space<vmem>>, vector<1x8x32xf32>
    %21 = vector.shape_cast %20 : vector<1x8x32xf32> to vector<8x32xf32>
    %cst_14 = arith.constant dense<0.000000e+00> : vector<8x32xf32>
    %22 = tpu.matmul %16, %21, %cst_14 {dimension_numbers = #tpu.dot_dimension_numbers<[1], [0], [0], [1], [0, 0, 1, 1], [], []>} : vector<8x8xf32>, vector<8x32xf32>, vector<8x32xf32> -> vector<8x32xf32>
    %c0_15 = arith.constant 0 : index
    %c0_16 = arith.constant 0 : index
    %c0_17 = arith.constant 0 : index
    %23 = vector.load %arg5[%c0_15, %c0_16, %c0_17] : memref<1x8x32xf32, #tpu.memory_space<vmem>>, vector<1x8x32xf32>
    %24 = vector.shape_cast %23 : vector<1x8x32xf32> to vector<8x32xf32>
    %25 = vector.shape_cast %22 : vector<8x32xf32> to vector<1x8x32xf32>
    tpu.vector_store %arg5[%c0_15, %c0_16, %c0_17], %25 {strides = array<i32>} : memref<1x8x32xf32, #tpu.memory_space<vmem>>, vector<1x8x32xf32>,
    return
  }
  func.func @transform_0(%arg0: i32, %arg1: i32) -> (i32, i32, i32) {
    %c0_i32 = arith.constant 0 : i32
    %c0_i32_0 = arith.constant 0 : i32
    return %arg0, %arg1, %c0_i32 : i32, i32, i32
  }
  func.func @transform_1(%arg0: i32, %arg1: i32) -> (i32, i32, i32) {
    %c0_i32 = arith.constant 0 : i32
    %c0_i32_0 = arith.constant 0 : i32
    %c0_i32_1 = arith.constant 0 : i32
    return %arg0, %c0_i32, %c0_i32_0 : i32, i32, i32
  }
  func.func @transform_2(%arg0: i32, %arg1: i32) -> (i32, i32, i32) {
    %c0_i32 = arith.constant 0 : i32
    %c0_i32_0 = arith.constant 0 : i32
    %c0_i32_1 = arith.constant 0 : i32
    return %arg0, %c0_i32, %c0_i32_0 : i32, i32, i32
  }
  func.func @transform_3(%arg0: i32, %arg1: i32) -> (i32, i32, i32) {
    %c0_i32 = arith.constant 0 : i32
    %c0_i32_0 = arith.constant 0 : i32
    return %arg0, %arg1, %c0_i32 : i32, i32, i32
  }
  func.func @transform_4(%arg0: i32, %arg1: i32) -> (i32, i32, i32) {
    %c0_i32 = arith.constant 0 : i32
    %c0_i32_0 = arith.constant 0 : i32
    return %arg0, %arg1, %c0_i32 : i32, i32, i32
  }
}

</mosaic_0001>

<bundles_post_ra>
// kernel: tpu_custom_call.1
= control target key start
LH: loop header
LB: loop body
LE: loop exit
PB: predicated region body
PF: predicated region fallthrough
CT: control target
= control target key end

     0   :  { %s1103_s0 = inlined_call_operand.hbm [shape: f32[2,8,32], index: 0, kind: input, shape index: {}]   ;;  %s1104_s1 = inlined_call_operand.hbm [shape: f32[2,8,32], index: 1, kind: input, shape index: {}]   ;;  %s1105_s2 = inlined_call_operand.hbm [shape: f32[2,8,32], index: 2, kind: input, shape index: {}]   ;;  %s1106_s3 = inlined_call_operand.hbm [shape: f32[2,8,32], index: 3, kind: output, shape index: {0}]   ;;  %s1107_s4 = inlined_call_operand.hbm [shape: f32[2,8,8], index: 4, kind: output, shape index: {1}]  }
   0x1   :  { %1111 = sst [smem:[#allocation19_spill]] %s1104_s1 }
   0x2   :  { %10 = vsyncpa [#allocation3], 0 }
   0x3   :  { %12 = vsyncpa [#allocation3 + $0x1], 0 }
   0x4   :  { %13 = vsyncpa [#allocation6], 0 }
   0x5   :  { %15 = vsyncpa [#allocation6 + $0x1], 0 }
   0x6   :  { %16 = vsyncpa [#allocation4], 0 }
   0x7   :  { %18 = vsyncpa [#allocation4 + $0x1], 0 }
   0x8   :  { %19 = vsyncpa [#allocation10], 0 }
   0x9   :  { %21 = vsyncpa [#allocation10 + $0x1], 0  ;;  %s923_s15 = smov 0   ;;  %s925_s16 = smov 0  }
   0xa   :  { %s927_s17 = smov 0   ;;  %s929_s18 = smov 0  }
   0xb   :  { %s931_s19 = smov 0   ;;  %s933_s20 = smov 0  }
   0xc LB: > { %1112 = sst [smem:[#allocation15_spill]] %s884_s17  ;;  %s954_s21 = sadd.s32 4294967295, %s896_s20   ;;  %s896_s20 = sphi %s933_s20, %s27_s20   ;;  %s892_s19 = sphi %s931_s19, %s1126_s19   ;;  %s888_s18 = sphi %s929_s18, %s1125_s18   ;;  %s884_s17 = sphi %s927_s17, %s1124_s17   ;;  %s880_s16 = sphi %s925_s16, %s1128_s16   ;;  %s876_s15 = sphi %s923_s15, %s1127_s15  }
   0xd   : > { %1113 = sst [smem:[#allocation16_spill]] %s892_s19  ;;  %s583_s22 = sadd.s32 4294967294, %s896_s20  }
   0xe   : > { %s39_s23 = sadd.s32 1, %s892_s19  ;;  %s48_s24 = sadd.s32 1, %s884_s17 }
   0xf   : > { %p41_p0 = scmp.ge.s32.totalorder %s39_s23, 2  ;;  %p55_p1 = scmp.ne.s32.totalorder %s884_s17, %s880_s16 }
  0x10   : > { %p56_p2 = scmp.eq.s32.totalorder %s896_s20, 0  ;;  %p61_p3 = scmp.ne.s32.totalorder %s880_s16, %s876_s15 }
  0x11   : > { %s1130_s23 = smov (%p41_p0, %s39_s23), 0  ;;  %p62_p5 = scmp.eq.s32.totalorder %s954_s21, 0 }
  0x12   : > { %1114 = sst [smem:[#allocation17_spill]] %s1130_s23  ;;  %p966_p4 = por %p56_p2, %p55_p1 }
  0x13   : > { %s43_s26 = ssub.s32 %s892_s19, %s1130_s23  ;;  %p139_p6 = scmp.eq.s32.totalorder %s954_s21, 1 }
  0x14   : > { %p46_p7 = scmp.eq.s32.totalorder %s43_s26, 0  ;;  %p974_p8 = por %p62_p5, %p61_p3 }
  0x15   : > { %p978_p9 = por %p139_p6, %p55_p1  ;;  %p145_p10 = scmp.eq.s32.totalorder %s583_s22, 1 }
  0x16   : > { %s983_s29 = scalar_select %p46_p7, %s884_s17, %s48_s24  }
  0x17   : > { %p985_p11 = por %p145_p10, %p61_p3  ;;  %p585_p12 = scmp.ge.s32.totalorder %s896_s20, 2 }
  0x18   : > { %1118 = sst [smem:[#allocation18_spill]] %s983_s29  ;;  %p634_p13 = scmp.lt.s32.totalorder %s896_s20, 2 }
  0x19   : > { %s193_s5 = sand.u32 1, %s884_s17   ;;  %s587_s7 = sshll.u32 %s892_s19, 3 }
  0x1a   : > { %s586_s6 = sshll.u32 %s193_s5, 3  ;;  %p995_p0 = pnand %p634_p13, %p966_p4 }
  0x1b   : > { %s213_s9 = sand.u32 1, %s896_s20   ;;  %s1121_s1 = sld [smem:[#allocation19_spill]] }
  0x1c   : > { %s217_s14 = scalar_lea.vmem [#allocation5], %s586_s6  ;;  %s214_s24 = scalar_lea.sflag [#allocation6], %s213_s9 }
  0x1d   : > { %s225_s22 = sshll.u32 %s217_s14, 4  ;;  %p592_p1 = scmp.ge.s32.totalorder %s896_s20, 1  ;;  %s226_s22 = int_to_ptr.vmem [resolvable:$true] %s225_s22 }
  0x1e   : > { %p249_p2 = scmp.lt.s32.totalorder %s896_s20, 3  ;;  %s202_s10 = scalar_lea.hbm %s1103_s0, %s587_s7 }
  0x1f   : > { %s204_s11 = sshll.u32 %s202_s10, 4  ;;  %s194_s14 = scalar_lea.sflag [#allocation3], %s193_s5  ;;  %s205_s11 = int_to_ptr.hbm [resolvable:$true] %s204_s11 }
  0x20   : > { %p1007_p3 = pnand %p592_p1, %p249_p2  ;;  %s236_s29 = scalar_lea.vmem [#allocation7], %s586_s6 }
  0x21   : > { %s221_s12 = scalar_lea.hbm %s1121_s1, %s587_s7  ;;  %s244_s17 = sshll.u32 %s236_s29, 4  ;;  %s245_s17 = int_to_ptr.vmem [resolvable:$true] %s244_s17 }
  0x22   : > { %s223_s13 = sshll.u32 %s221_s12, 4  ;;  %s197_s12 = scalar_lea.vmem [#allocation2], %s586_s6  ;;  %s224_s13 = int_to_ptr.hbm [resolvable:$true] %s223_s13 }
  0x23   : > { %623 = dma.hbm_to_vmem [thread:$0]  (!%p995_p0), %s224_s13, 128, %s226_s22, %s214_s24  }
  0x24   : > { %s206_s1 = sshll.u32 %s197_s12, 4  ;;  %s240_s22 = scalar_lea.hbm %s1105_s2, %s587_s7  ;;  %s207_s1 = int_to_ptr.vmem [resolvable:$true] %s206_s1 }
  0x25   : > { %620 = dma.hbm_to_vmem [thread:$0]  (!%p995_p0), %s205_s11, 128, %s207_s1, %s194_s14  }
  0x26   : > { %s242_s19 = sshll.u32 %s240_s22, 4  ;;  %253 = sbr.rel (%p1007_p3) target bundleno = 560 (0x230), region = 32  ;;  %s243_s19 = int_to_ptr.hbm [resolvable:$true] %s242_s19 }
  0x27   : > { %626 = dma.hbm_to_vmem [thread:$0]  (!%p995_p0), %s243_s19, 128, %s245_s17, %s214_s24  }
  0x28   : > { %s1024_s23 = sand.u32 (!%p1007_p3), 1, %s880_s16  }
  0x29   : > { %s1027_s1 = sshll.u32 (!%p1007_p3), %s1024_s23, 3  ;;  %s256_s5 = scalar_lea.sflag (!%p1007_p3), [#allocation3], %s1024_s23 }
  0x2a   : > { %s259_s7 = scalar_lea.vmem (!%p1007_p3), [#allocation2], %s1027_s1 }
  0x2b   : > { %859 = dma.done.wait (%p974_p8), %s256_s5, 128  }
  0x2c   : > { %861 = vsyncadd (%p974_p8), %s256_s5, 4294967168  ;;  %s265_s17 = sand.u32 1, %s954_s21   ;;  %s269_s29 = scalar_lea.vmem [#allocation5], %s1027_s1 }
  0x2d   : > { %s266_s19 = scalar_lea.sflag [#allocation6], %s265_s17 }
  0x2e   : > { %863 = dma.done.wait (%p974_p8), %s266_s19, 256  }
  0x2f   : > { %865 = vsyncadd (%p974_p8), %s266_s19, 4294967040  ;;  %vm323_vm0 = vcmask 261120   ;;  %v321_v0 = vld [vmem:[%s269_s29] sm:$0xff]  ;;  %v320_v1 = vld [vmem:[%s259_s7] sm:$0xff]  ;;  %vm350_vm1 = vcmask 64512   ;;  %s279_s21 = scalar_lea.vmem [#allocation7], %s1027_s1 }
  0x30   : > { %598 = vmatpush.xpose.msk.msra.mxu0 %vm323_vm0, %v321_v0  ;;  %v322_v2 = vmul.f32 0.17677669, %v320_v1  ;;  %v363_v10 = vld [vmem:[%s279_s21] sm:$0xff]  ;;  %s603_s27 = sshll.u32 %s888_s18, 3  ;;  %s319_s25 = scalar_lea.vmem [#allocation9], %s1027_s1 }
  0x31   : > { %382 = vmatpush.msra.mxu1 %v363_v10  ;;  %s420_s24 = scalar_lea.hbm %s1107_s4, %s603_s27  ;;  %s422_s26 = sshll.u32 %s319_s25, 4  ;;  %s423_s26 = int_to_ptr.vmem [resolvable:$true] %s422_s26 }
  0x32   : > { %s424_s10 = sshll.u32 %s420_s24, 4  ;;  %s394_s11 = scalar_lea.sflag [#allocation10], %s1024_s23  ;;  %s425_s10 = int_to_ptr.hbm [resolvable:$true] %s424_s10 }
  0x33   : > { %599 = vmatmul.msk.f32.vlgmr.msra.gmra.mxu0 %vm323_vm0, %v322_v2  ;;  %s792_s12 = sshra.s32 %s425_s10, 4  ;;  %s798_s13 = scalar_lea.hbm %s1107_s4, 16  ;;  %s793_s12 = int_to_ptr.hbm [resolvable:$true] %s792_s12 }
  0x34   : > { %s794_s18 = scalar_lea.hbm %s793_s12, 8  ;;  %p799_p7 = scmp.lt.s32.totalorder %s793_s12, %s1107_s4 }
  0x35   : > { %p795_p4 = scmp.ne.s32.totalorder %s793_s12, %s794_s18  ;;  %p800_p8 = scmp.lt.s32.totalorder %s798_s13, %s794_s18 }
  0x37   : > { %p796_p5 = pnand %p795_p4, %p978_p9  ;;  %p801_p10 = por %p800_p8, %p799_p7 }
  0x39   : > { %p797_p6 = pneg %p796_p5 }
  0x3b   : > { %p802_p13 = pnand %p801_p10, %p797_p6 }
  0xb0   : > { %v347_v3 = vpop.f32.mrf.mxu0 }
  0xb1   : > { %v351_v4 = vsel %vm350_vm1, %v347_v3, -inf }
  0xb2   : > { %352 = vmax.xlane.f32.xlu0 %v351_v4 }
 0x125   : > { %v353_v5 = vpop.xlane.xlu0 %352 }
 0x126   : > { %v354_v6 = vsub.f32 %v347_v3, %v353_v5 }
 0x128   : > { %v355_v7 = vmul.f32 1.442695, %v354_v6 }
 0x12a   : > { %684 = vpow2.f32 %v355_v7 }
 0x130   : > { %v685_v8 = vpop.eup %684 }
 0x131   : > { %v357_v9 = vsel %vm350_vm1, %v685_v8, 0.0 }
 0x132   : > { %358 = vadd.xlane.f32.xlu0 %v357_v9 }
 0x1a5   : > { %v359_v11 = vpop.xlane.xlu0 %358 }
 0x1a6   : > { %686 = vrcp.f32 %v359_v11 }
 0x1ac   : > { %v687_v12 = vpop.eup %686 }
 0x1ad   : > { %v361_v13 = vmul.f32 %v687_v12, %v685_v8 }
 0x1af   : > { %600 = vmatmul.msk.f32.vlgmr.msra.gmra.mxu1 %vm350_vm1, %v361_v13  ;;  %362 = vst.msk [vmem:[%s319_s25] sm:$0xff] %vm350_vm1, %v361_v13 }
 0x1b0   : > { %805 = shalt.err (!%p802_p13)
}
 0x1b1   : > { %614 = dma.vmem_to_hbm [thread:$0]  (%p978_p9), %s423_s26, 128, %s425_s10, %s394_s11  }
 0x1b2   : > { %s405_s19 = scalar_lea.hbm %s1106_s3, %s603_s27  ;;  %s312_s29 = scalar_lea.vmem [#allocation8], %s1027_s1 }
 0x1b3   : > { %s407_s21 = sshll.u32 %s312_s29, 4  ;;  %s409_s6 = sshll.u32 %s405_s19, 4  ;;  %s408_s21 = int_to_ptr.vmem [resolvable:$true] %s407_s21  ;;  %s410_s6 = int_to_ptr.hbm [resolvable:$true] %s409_s6 }
 0x1b4   : > { %s389_s8 = scalar_lea.sflag [#allocation4], %s1024_s23  ;;  %s820_s24 = sshra.s32 %s410_s6, 4  ;;  %s821_s24 = int_to_ptr.hbm [resolvable:$true] %s820_s24 }
 0x1b5   : > { %s822_s25 = scalar_lea.hbm %s821_s24, 8  ;;  %s826_s27 = scalar_lea.hbm %s1106_s3, 16 }
 0x1b6   : > { %p823_p0 = scmp.ne.s32.totalorder %s821_s24, %s822_s25  ;;  %p827_p3 = scmp.lt.s32.totalorder %s821_s24, %s1106_s3 }
 0x1b7   : > { %p828_p4 = scmp.lt.s32.totalorder %s826_s27, %s822_s25 }
 0x1b8   : > { %p824_p1 = pnand %p823_p0, %p978_p9 }
 0x1b9   : > { %p829_p5 = por %p828_p4, %p827_p3 }
 0x1ba   : > { %p825_p2 = pneg %p824_p1 }
 0x1bc   : > { %p830_p6 = pnand %p829_p5, %p825_p2 }
 0x22c   : > { %v384_v14 = vpop.f32.mrf.mxu1 }
 0x22d   : > { %387 = vst.msk [vmem:[%s312_s29] sm:$0xff] %vm323_vm0, %v384_v14 }
 0x22e   : > { %833 = shalt.err (!%p830_p6)
}
 0x22f   : > { %613 = dma.vmem_to_hbm [thread:$0]  (%p978_p9), %s408_s21, 128, %s410_s6, %s389_s8  }
 0x230 PF: > { %s436_s23 = sand.u32 1, %s876_s15   ;;  %p628_p7 = pnand %p585_p12, %p985_p11 }
 0x231   : > { %s437_s12 = scalar_lea.sflag [#allocation4], %s436_s23 }
 0x232   : > { %p629_p8 = pneg %p628_p7 }
 0x234   : > { %867 = dma.done.wait (%p629_p8), %s437_s12, 128  }
 0x235   : > { %869 = vsyncadd (%p629_p8), %s437_s12, 4294967168  ;;  %s447_s18 = scalar_lea.sflag [#allocation10], %s436_s23 }
 0x236   : > { %871 = dma.done.wait (%p629_p8), %s447_s18, 128  }
 0x237   : > { %873 = vsyncadd (%p629_p8), %s447_s18, 4294967168  ;;  %s27_s20 = sadd.s32 1, %s896_s20   ;;  %s1123_s28 = sld [smem:[#allocation15_spill]] }
 0x238   : > { %p24_p10 = scmp.ge.s32.totalorder %s27_s20, 4   ;;  %s1124_s17 = sld [smem:[#allocation18_spill]] }
 0x239   : > { %s1125_s18 = sld [smem:[#allocation16_spill]]  ;;  %s1127_s15 = smov %s880_s16 }
 0x23a   : > { %s1126_s19 = sld [smem:[#allocation17_spill]]  ;;  %26 = sbr.rel (!%p24_p10) target bundleno = 12 (0xc), region = 118 }
 0x23d   : > { %s1128_s16 = smov %s1123_s28 }
 0x23f   :  { %453 = vsyncpa [#allocation3], 1 }
 0x240   :  { %455 = vsyncpa [#allocation3 + $0x1], 1 }
 0x241   :  { %456 = vsyncpa [#allocation6], 1 }
 0x242   :  { %458 = vsyncpa [#allocation6 + $0x1], 1 }
 0x243   :  { %459 = vsyncpa [#allocation4], 1 }
 0x244   :  { %461 = vsyncpa [#allocation4 + $0x1], 1 }
 0x245   :  { %462 = vsyncpa [#allocation10], 1 }
 0x246   :  { %464 = vsyncpa [#allocation10 + $0x1], 1 }

</bundles_post_ra>
